<compile_context>
chip_gen: v6e
topology: v6e:2x2x1
jax: 0.10.0
libtpu: 0.0.40
codegen_flags: <defaults>
</compile_context>

<pallas_src>
import functools

import jax
import jax.numpy as jnp
from jax.experimental import pallas as pl
from jax.experimental.pallas import tpu as pltpu


def _round_up(x, m):
    return (x + m - 1) // m * m


def _vmem_capacity_bytes():
    try:
        return int(pltpu.get_tpu_info().vmem_capacity_bytes)
    except Exception:
        return 64 * 1024 * 1024  # conservative (v7x-sized) fallback


def _chunk_divisor(tb, target):
    """Largest multiple of 8 that divides tb and is <= target."""
    m = tb // 8
    for d in range(max(min(target // 8, m), 1), 0, -1):
        if m % d == 0:
            return 8 * d
    return 8


def _derive_tiles(B, F, D, itemsize, batch_tile, use_roll):
    """Pick (batch tile tb, inner row chunk, vmem_limit)."""
    vmem_cap = _vmem_capacity_bytes()

    in_row = _round_up(F * D, 128) * itemsize   # lane-padded input row
    out_row = _round_up(D, 128) * itemsize      # lane-padded output row

    if batch_tile is None:
        # ~2 MiB input block: HBM roofline is already ~saturated here, and
        # small blocks keep the pipeline overlapped on every generation.
        tb_bytes = max((2 << 20) // in_row, 8)
        # >= 8 grid steps whenever B >= 64 so the DMA pipeline overlaps and
        # v7x's 2 TensorCores both get work (B < 64: best effort, tb = 8).
        tb_steps = max(8, (B // 64) * 8)
        tb = min(tb_bytes, tb_steps)
    else:
        # Validate an explicit tile against VMEM: keep the double-buffered
        # working set under ~1/4 of physical VMEM.
        tb = max(int(batch_tile), 8)
        tb_cap = max((vmem_cap // 4) // (2 * (in_row + out_row)), 8)
        tb = min(tb, tb_cap)
    tb = max((tb // 8) * 8, 8)  # (8,128) block constraint on the row dim

    # Inner row chunk: keep each f32 accumulator around ~32 KiB so the live
    # set (s + ss + x + temps) stays well inside the 64-vreg file.  The roll
    # path holds full-width (F*D) rows live; the slice path only D-wide rows.
    live_w = (F * D) if use_roll else _round_up(D, 128)
    chunk_target = max((32 * 1024) // (live_w * 4), 8)
    chunk = _chunk_divisor(tb, min(chunk_target, tb))

    # Scoped VMEM limit: modest, with headroom for Mosaic internal scratch.
    working_set = 2 * tb * (in_row + out_row)
    vmem_limit = int(min(3 * vmem_cap // 4,
                         max(32 << 20, working_set + (8 << 20))))
    return tb, chunk, vmem_limit


def _order2_kernel(x_ref, o_ref, *, num_fields, chunk_rows, use_roll):
    # x_ref: (tb, F*D) lane-dense block; field f occupies lanes [f*D, (f+1)*D).
    # o_ref: (tb, D)
    tb, emb = o_ref.shape
    width = num_fields * emb
    n_chunks = tb // chunk_rows  # chunk_rows divides tb by construction

    @pl.loop(0, n_chunks)
    def _(c):
        r0 = pl.multiple_of(c * chunk_rows, chunk_rows)
        if use_roll:
            # One full-width load; reduce the D-wide lane groups with a
            # log2(F) roll tree on the (otherwise idle) XLU slot.
            x = x_ref[pl.ds(r0, chunk_rows), :].astype(jnp.float32)
            s = x
            ss = x * x
            step = emb
            while step < width:
                s = s + pltpu.roll(s, shift=width - step, axis=1)
                ss = ss + pltpu.roll(ss, shift=width - step, axis=1)
                step *= 2
            s0 = s[:, :emb]
            cross = 0.5 * (s0 * s0 - ss[:, :emb])
        else:
            s = jnp.zeros((chunk_rows, emb), jnp.float32)
            ss = jnp.zeros((chunk_rows, emb), jnp.float32)
            # Per-field accumulation: live set is ~3 (chunk, D) tiles.
            for f in range(num_fields):
                xf = x_ref[pl.ds(r0, chunk_rows), f * emb:(f + 1) * emb]
                xf = xf.astype(jnp.float32)  # f32 accumulation (bf16-safe)
                s = s + xf
                ss = ss + xf * xf
            cross = 0.5 * (s * s - ss)
        o_ref[pl.ds(r0, chunk_rows), :] = cross.astype(o_ref.dtype)


def order2_inter(inputs, *, batch_tile=None):
    """FM second-order interaction: (B, F, D) -> (B, D)."""
    B, F, D = inputs.shape
    dtype = inputs.dtype
    itemsize = dtype.itemsize

    # Roll-tree field reduction only where lowering is guaranteed clean:
    # power-of-two F, sub-vreg D, and a lane-aligned total width.
    use_roll = (F > 1 and (F & (F - 1)) == 0 and D < 128
                and (F * D) % 128 == 0)

    tb, chunk, vmem_limit = _derive_tiles(B, F, D, itemsize, batch_tile,
                                          use_roll)

    # Free row-major reshape: fields folded into the lane axis.
    x2d = inputs.reshape(B, F * D)

    # No batch padding: partial tail block reads are unspecified but each
    # output row depends only on its own input row, and Pallas drops the
    # out-of-range tail writes.
    grid = pl.cdiv(B, tb)

    out = pl.pallas_call(
        functools.partial(_order2_kernel, num_fields=F, chunk_rows=chunk,
                          use_roll=use_roll),
        out_shape=jax.ShapeDtypeStruct((B, D), dtype),
        grid_spec=pl.GridSpec(
            grid=(grid,),
            in_specs=[pl.BlockSpec((tb, F * D), lambda i: (i, 0))],
            out_specs=pl.BlockSpec((tb, D), lambda i: (i, 0)),
        ),
        compiler_params=pltpu.CompilerParams(
            dimension_semantics=("parallel",),  # shards across v7x's 2 TCs
            vmem_limit_bytes=int(vmem_limit),
        ),
    )(x2d)
    return out


def _reference(inputs):
    square_of_sum = jnp.sum(inputs, axis=1) ** 2
    sum_of_square = jnp.sum(inputs ** 2, axis=1)
    return 0.5 * (square_of_sum - sum_of_square)


if __name__ == "__main__":
    key = jax.random.PRNGKey(0)
    k1, k2, k3, k4 = jax.random.split(key, 4)

    # Primary small FM-like shape: power-of-two F, F*D = 128 -> roll path.
    B, F, D = 8, 4, 32
    x = jax.random.normal(k1, (B, F, D), dtype=jnp.float32)
    out = jax.block_until_ready(order2_inter(x))
    ref = _reference(x)
    assert out.shape == (B, D)
    assert jnp.allclose(out, ref, atol=1e-5, rtol=1e-5), "f32 mismatch"

    # Ragged batch (tail block masked by Pallas) + non-power-of-two F and
    # small F*D (< 128): exercises the lane-group slicing fallback.
    B2, F2, D2 = 10, 5, 16
    x2 = jax.random.normal(k2, (B2, F2, D2), dtype=jnp.float32)
    out2 = jax.block_until_ready(order2_inter(x2))
    ref2 = _reference(x2)
    assert out2.shape == (B2, D2)
    assert jnp.allclose(out2, ref2, atol=1e-5, rtol=1e-5), "ragged mismatch"

    # Multi-step grid with D = 128 (lane-aligned slicing path, partial tail).
    B3, F3, D3 = 40, 3, 128
    x3 = jax.random.normal(k3, (B3, F3, D3), dtype=jnp.float32)
    out3 = jax.block_until_ready(order2_inter(x3))
    ref3 = _reference(x3)
    assert out3.shape == (B3, D3)
    assert jnp.allclose(out3, ref3, atol=1e-4, rtol=1e-4), "grid mismatch"

    # bf16 inputs: f32 accumulation inside the kernel, rounded back to bf16.
    x4 = jax.random.normal(k4, (B, F, D), dtype=jnp.bfloat16)
    out4 = jax.block_until_ready(order2_inter(x4))
    ref4 = _reference(x4.astype(jnp.float32)).astype(jnp.bfloat16)
    assert out4.shape == (B, D)
    assert jnp.allclose(out4.astype(jnp.float32), ref4.astype(jnp.float32),
                        atol=5e-2, rtol=5e-2), "bf16 mismatch"

    print("KERNEL_OK")
</pallas_src>

<mosaic_0001>
module attributes {stable_mosaic.version = 11 : i64} {
  func.func @_order2_kernel(%arg0: i32, %arg1: memref<8x128xf32, #tpu.memory_space<vmem>>, %arg2: memref<8x32xf32, #tpu.memory_space<vmem>>) attributes {dimension_semantics = [#tpu.dimension_semantics<parallel>], iteration_bounds = array<i64: 1>, scalar_prefetch = 0 : i64, scratch_operands = 0 : i64, tpu.core_type = #tpu.core_type<tc>, window_params = [{transform_indices = @transform_0, window_bounds = array<i64: 8, 128>}, {transform_indices = @transform_1, window_bounds = array<i64: 8, 32>}]} {
    %c0_i32 = arith.constant 0 : i32
    %c1_i32 = arith.constant 1 : i32
    %0 = arith.muli %c0_i32, %c1_i32 : i32
    %c0_i32_0 = arith.constant 0 : i32
    %1 = arith.addi %c0_i32_0, %0 : i32
    %c8_i32 = arith.constant 8 : i32
    %2 = arith.muli %1, %c8_i32 : i32
    %3 = tpu.assume_multiple %2, 8 : i32
    %4 = arith.index_cast %3 : i32 to index
    %c0 = arith.constant 0 : index
    %5 = vector.load %arg1[%4, %c0] : memref<8x128xf32, #tpu.memory_space<vmem>>, vector<8x128xf32>
    %6 = arith.mulf %5, %5 : vector<8x128xf32>
    %c96_i32 = arith.constant 96 : i32
    %7 = tpu.dynamic_rotate %5 by %c96_i32 dim 1 : vector<8x128xf32>, i32 -> vector<8x128xf32>
    %8 = arith.addf %5, %7 : vector<8x128xf32>
    %c96_i32_1 = arith.constant 96 : i32
    %9 = tpu.dynamic_rotate %6 by %c96_i32_1 dim 1 : vector<8x128xf32>, i32 -> vector<8x128xf32>
    %10 = arith.addf %6, %9 : vector<8x128xf32>
    %c64_i32 = arith.constant 64 : i32
    %11 = tpu.dynamic_rotate %8 by %c64_i32 dim 1 : vector<8x128xf32>, i32 -> vector<8x128xf32>
    %12 = arith.addf %8, %11 : vector<8x128xf32>
    %c64_i32_2 = arith.constant 64 : i32
    %13 = tpu.dynamic_rotate %10 by %c64_i32_2 dim 1 : vector<8x128xf32>, i32 -> vector<8x128xf32>
    %14 = arith.addf %10, %13 : vector<8x128xf32>
    %15 = vector.extract_strided_slice %12 {offsets = [0, 0], sizes = [8, 32], strides = [1, 1]} : vector<8x128xf32> to vector<8x32xf32>
    %16 = arith.mulf %15, %15 : vector<8x32xf32>
    %17 = vector.extract_strided_slice %14 {offsets = [0, 0], sizes = [8, 32], strides = [1, 1]} : vector<8x128xf32> to vector<8x32xf32>
    %18 = arith.subf %16, %17 : vector<8x32xf32>
    %cst = arith.constant 5.000000e-01 : f32
    %19 = vector.broadcast %cst : f32 to vector<8x32xf32>
    %20 = arith.mulf %19, %18 : vector<8x32xf32>
    %21 = arith.index_cast %3 : i32 to index
    %c0_3 = arith.constant 0 : index
    %22 = vector.load %arg2[%21, %c0_3] : memref<8x32xf32, #tpu.memory_space<vmem>>, vector<8x32xf32>
    tpu.vector_store %arg2[%21, %c0_3], %20 {strides = array<i32>} : memref<8x32xf32, #tpu.memory_space<vmem>>, vector<8x32xf32>,
    %c1_i32_4 = arith.constant 1 : i32
    return
  }
  func.func @transform_0(%arg0: i32) -> (i32, i32) {
    %c0_i32 = arith.constant 0 : i32
    %c0_i32_0 = arith.constant 0 : i32
    return %arg0, %c0_i32 : i32, i32
  }
  func.func @transform_1(%arg0: i32) -> (i32, i32) {
    %c0_i32 = arith.constant 0 : i32
    %c0_i32_0 = arith.constant 0 : i32
    return %arg0, %c0_i32 : i32, i32
  }
}

</mosaic_0001>

<bundles_post_ra>
// kernel: tpu_custom_call.1
= control target key start
LH: loop header
LB: loop body
LE: loop exit
PB: predicated region body
PF: predicated region fallthrough
CT: control target
= control target key end

     0   :  { %6 = vsyncpa [#allocation3], 0  ;;  %s123_s0 = inlined_call_operand.hbm [shape: f32[8,128], index: 0, kind: input, shape index: {}]   ;;  %s124_s1 = inlined_call_operand.hbm [shape: f32[8,32], index: 1, kind: output, shape index: {}]  }
   0x1   :  { %7 = vsyncpa [#allocation4], 0  ;;  %s103_s6 = smov [#allocation2]  }
   0x2   :  { %s14_s7 = sshll.u32 %s103_s6, 4  ;;  %s15_s7 = int_to_ptr.vmem [resolvable:$true] %s14_s7 }
   0x3   :  { %s67_s8 = scalar_lea.vmem %s15_s7, 128  ;;  %p72_p1 = scmp.lt.s32.totalorder %s15_s7, %s15_s7 }
   0x4   :  { %p68_p0 = scmp.ne.s32.totalorder %s15_s7, %s67_s8  ;;  %p73_p2 = scmp.lt.s32.totalorder %s67_s8, %s67_s8 }
   0x6   :  { %p74_p3 = por %p73_p2, %p72_p1 }
   0x8   :  { %p75_p4 = pnand %p74_p3, %p68_p0 }
   0xa   :  { %78 = shalt.err (!%p75_p4)
}
   0xb   :  { %17 = dma.hbm_to_vmem [thread:$0]  %s123_s0, 128, %s15_s7, [#allocation3]  }
   0xc   :  { %99 = dma.done.wait [#allocation3], 128  }
   0xd   :  { %100 = vsyncadd [#allocation3], 4294967168  ;;  %v21_v0 = vld [vmem:[#allocation2] sm:$0xff]  ;;  %s104_s11 = smov 96   ;;  %s105_s12 = smov 64   ;;  %vm38_vm0 = vcmask 261120  }
   0xe   :  { %23 = vrot.lane.b32.xlu0 %v21_v0, %s104_s11  ;;  %v22_v1 = vmul.f32 %v21_v0, %v21_v0  ;;  %s106_s0 = smov [#allocation5]  }
   0xf   :  { %s46_s13 = sshll.u32 %s106_s0, 4  ;;  %s47_s13 = int_to_ptr.vmem [resolvable:$true] %s46_s13 }
  0x10   :  { %s79_s14 = scalar_lea.vmem %s47_s13, 128  ;;  %p84_p6 = scmp.lt.s32.totalorder %s47_s13, %s47_s13 }
  0x11   :  { %p80_p5 = scmp.ne.s32.totalorder %s47_s13, %s79_s14  ;;  %p85_p7 = scmp.lt.s32.totalorder %s79_s14, %s79_s14 }
  0x12   :  { %26 = vrot.lane.b32.xlu0 %v22_v1, %s104_s11 }
  0x13   :  { %p86_p8 = por %p85_p7, %p84_p6 }
  0x15   :  { %p87_p9 = pnand %p86_p8, %p80_p5 }
  0x80   :  { %v24_v2 = vpop.permute.xlu0 %23 }
  0x81   :  { %v25_v3 = vadd.f32 %v24_v2, %v21_v0 }
  0x83   :  { %29 = vrot.lane.b32.xlu1 %v25_v3, %s105_s12 }
  0x84   :  { %v27_v4 = vpop.permute.xlu0 %26 }
  0x85   :  { %v28_v5 = vadd.f32 %v27_v4, %v22_v1 }
  0x87   :  { %32 = vrot.lane.b32.xlu1 %v28_v5, %s105_s12 }
  0xf5   :  { %v30_v6 = vpop.permute.xlu1 %29 }
  0xf6   :  { %v31_v7 = vadd.f32 %v30_v6, %v25_v3 }
  0xf8   :  { %v35_v9 = vmul.f32 %v31_v7, %v31_v7 }
  0xf9   :  { %v33_v8 = vpop.permute.xlu1 %32 }
  0xfa   :  { %v34_v10 = vadd.f32 %v33_v8, %v28_v5 }
  0xfc   :  { %v36_v11 = vsub.f32 %v35_v9, %v34_v10 }
  0xfe   :  { %v37_v12 = vmul.f32 0.5, %v36_v11 }
 0x100   :  { %39 = vst.msk [vmem:[#allocation5] sm:$0xff] %vm38_vm0, %v37_v12 }
 0x101   :  { %90 = shalt.err (!%p87_p9)
}
 0x102   :  { %49 = dma.vmem_to_hbm [thread:$0]  %s47_s13, 128, %s124_s1, [#allocation4]  }
 0x103   :  { %101 = dma.done.wait [#allocation4], 128  }
 0x104   :  { %102 = vsyncadd [#allocation4], 4294967168 }
 0x105   :  { %53 = vsyncpa [#allocation3], 1 }
 0x106   :  { %54 = vsyncpa [#allocation4], 1 }

</bundles_post_ra>
